<compile_context>
chip_gen: v7x
topology: tpu7x:2x2x1
jax: 0.10.0
libtpu: 0.0.40
codegen_flags: <defaults>
</compile_context>

<pallas_src>
import functools
import math

import jax
import jax.numpy as jnp
from jax.experimental import pallas as pl
from jax.experimental.pallas import tpu as pltpu


# Large finite negative (avoids -inf - -inf NaNs in the online softmax).
DEFAULT_MASK_VALUE = -0.7 * float(jnp.finfo(jnp.float32).max)

# Explicit scoped-VMEM budget (perf feedback): above the 16/32 MiB defaults so
# large tiles can double-buffer, but below v7x's 64 MiB physical VMEM.
_VMEM_LIMIT_BYTES = 48 * 1024 * 1024


def _tile(dim: int, target: int) -> int:
    """Largest tile <= target that divides dim (full dim if dim <= target)."""
    if dim <= target:
        return dim
    t = target
    while dim % t:
        t //= 2
    return t


# ---------------------------------------------------------------------------
# Tiled matmul kernel (used for the fused QKV projection and the output proj).
# ---------------------------------------------------------------------------
def _matmul_kernel(a_ref, b_ref, o_ref, acc_ref):
    @pl.when(pl.program_id(2) == 0)
    def _():
        acc_ref[...] = jnp.zeros_like(acc_ref)

    acc_ref[...] += jnp.dot(
        a_ref[...], b_ref[...], preferred_element_type=jnp.float32
    )

    @pl.when(pl.program_id(2) == pl.num_programs(2) - 1)
    def _():
        o_ref[...] = acc_ref[...].astype(o_ref.dtype)


def matmul_pallas(a, b, *, out_dtype=None, tm=256, tn=256, tk=512):
    """a: (M, K), b: (K, N) -> (M, N), f32 accumulation on the MXU."""
    M, K = a.shape
    K2, N = b.shape
    assert K == K2, (a.shape, b.shape)
    out_dtype = a.dtype if out_dtype is None else out_dtype
    tm, tn, tk = _tile(M, tm), _tile(N, tn), _tile(K, tk)

    return pl.pallas_call(
        _matmul_kernel,
        out_shape=jax.ShapeDtypeStruct((M, N), out_dtype),
        grid_spec=pltpu.PrefetchScalarGridSpec(
            num_scalar_prefetch=0,
            grid=(M // tm, N // tn, K // tk),
            in_specs=[
                pl.BlockSpec((tm, tk), lambda i, j, k: (i, k)),
                pl.BlockSpec((tk, tn), lambda i, j, k: (k, j)),
            ],
            out_specs=pl.BlockSpec((tm, tn), lambda i, j, k: (i, j)),
            scratch_shapes=[pltpu.VMEM((tm, tn), jnp.float32)],
        ),
        compiler_params=pltpu.CompilerParams(
            dimension_semantics=("parallel", "parallel", "arbitrary"),
            vmem_limit_bytes=_VMEM_LIMIT_BYTES,
        ),
    )(a, b)


# ---------------------------------------------------------------------------
# Flash-attention kernel (online softmax, additive mask bias).
# ---------------------------------------------------------------------------
def _attention_kernel(q_ref, k_ref, v_ref, bias_ref, o_ref,
                      m_sc, l_sc, acc_sc, *, scale):
    ki = pl.program_id(2)

    @pl.when(ki == 0)
    def _():
        m_sc[...] = jnp.full_like(m_sc, DEFAULT_MASK_VALUE)
        l_sc[...] = jnp.zeros_like(l_sc)
        acc_sc[...] = jnp.zeros_like(acc_sc)

    q = q_ref[...]          # (tq, D)
    k = k_ref[...]          # (tkv, D)
    v = v_ref[...]          # (tkv, D)

    # s = (q @ k^T) * scale + mask_bias, accumulated in f32 on the MXU.
    s = jax.lax.dot_general(
        q, k, (((1,), (1,)), ((), ())), preferred_element_type=jnp.float32
    )
    s = s * scale + bias_ref[...]                       # (tq, tkv) f32

    m_prev = m_sc[...]                                  # (tq, 1)
    m_new = jnp.maximum(m_prev, s.max(axis=-1, keepdims=True))
    alpha = jnp.exp(m_prev - m_new)
    p = jnp.exp(s - m_new)

    l_sc[...] = alpha * l_sc[...] + p.sum(axis=-1, keepdims=True)
    acc_sc[...] = alpha * acc_sc[...] + jnp.dot(
        p.astype(v.dtype), v, preferred_element_type=jnp.float32
    )
    m_sc[...] = m_new

    @pl.when(ki == pl.num_programs(2) - 1)
    def _():
        o_ref[...] = (acc_sc[...] / l_sc[...]).astype(o_ref.dtype)


def flash_attention(q, k, v, bias, *, scale, block_q=256, block_kv=512):
    """q, k, v: (B*H, S, D); bias: (S, S) additive f32 mask. Returns (B*H, S, D)."""
    BH, S, D = q.shape
    tq = _tile(S, block_q)
    tkv = _tile(S, block_kv)

    kernel = functools.partial(_attention_kernel, scale=scale)
    return pl.pallas_call(
        kernel,
        out_shape=jax.ShapeDtypeStruct((BH, S, D), q.dtype),
        grid_spec=pltpu.PrefetchScalarGridSpec(
            num_scalar_prefetch=0,
            grid=(BH, S // tq, S // tkv),
            in_specs=[
                pl.BlockSpec((None, tq, D), lambda bh, qi, ki: (bh, qi, 0)),
                pl.BlockSpec((None, tkv, D), lambda bh, qi, ki: (bh, ki, 0)),
                pl.BlockSpec((None, tkv, D), lambda bh, qi, ki: (bh, ki, 0)),
                pl.BlockSpec((tq, tkv), lambda bh, qi, ki: (qi, ki)),
            ],
            out_specs=pl.BlockSpec((None, tq, D), lambda bh, qi, ki: (bh, qi, 0)),
            scratch_shapes=[
                pltpu.VMEM((tq, 1), jnp.float32),   # running max
                pltpu.VMEM((tq, 1), jnp.float32),   # running denom
                pltpu.VMEM((tq, D), jnp.float32),   # output accumulator
            ],
        ),
        compiler_params=pltpu.CompilerParams(
            dimension_semantics=("parallel", "parallel", "arbitrary"),
            vmem_limit_bytes=_VMEM_LIMIT_BYTES,
        ),
    )(q, k, v, bias)


# ---------------------------------------------------------------------------
# RoPE (interleaved pairs, matches the PyTorch apply_rope) — cheap JAX glue.
# ---------------------------------------------------------------------------
def _apply_rope(x, rope):
    """x: (B, S, H, D); rope: (>=S, D//2, 2) f32 -> same shape/dtype as x."""
    B, S, H, D = x.shape
    xf = x.astype(jnp.float32).reshape(B, S, H, D // 2, 2)
    rc = rope[:S].reshape(1, S, 1, D // 2, 2).astype(jnp.float32)
    x0, x1 = xf[..., 0], xf[..., 1]
    c, s = rc[..., 0], rc[..., 1]
    out = jnp.stack([x0 * c - x1 * s, x1 * c + x0 * s], axis=-1)
    return out.reshape(B, S, H, D).astype(x.dtype)


# ---------------------------------------------------------------------------
# Full SelfAttention forward (kv_cache=None path).
# ---------------------------------------------------------------------------
@functools.partial(jax.jit, static_argnames=("n_heads", "compute_dtype"))
def self_attention(x, w_attn, w_proj, rope, mask, *, n_heads, compute_dtype=None):
    """x: (B, S, E); w_attn: (3E, E); w_proj: (E, E); rope: (>=S, D/2, 2);
    mask: broadcastable boolean causal mask (..., S, S). Returns y: (B, S, E)."""
    B, S, E = x.shape
    D = E // n_heads
    cdt = x.dtype if compute_dtype is None else compute_dtype

    # Fused QKV projection: one wide (E x 3E) matmul on the MXU.
    x2d = x.reshape(B * S, E).astype(cdt)
    qkv = matmul_pallas(x2d, w_attn.T.astype(cdt), out_dtype=cdt)   # (M, 3E)
    qkv = qkv.reshape(B, S, 3, n_heads, D)
    q, k, v = qkv[:, :, 0], qkv[:, :, 1], qkv[:, :, 2]              # (B, S, H, D)

    q = _apply_rope(q, rope)
    k = _apply_rope(k, rope)

    # (B, S, H, D) -> (B*H, S, D)
    q = q.transpose(0, 2, 1, 3).reshape(B * n_heads, S, D).astype(cdt)
    k = k.transpose(0, 2, 1, 3).reshape(B * n_heads, S, D).astype(cdt)
    v = v.transpose(0, 2, 1, 3).reshape(B * n_heads, S, D).astype(cdt)

    # Boolean mask -> additive f32 bias shared across batch/heads.
    mask2d = jnp.reshape(mask, mask.shape[-2:])
    bias = jnp.where(mask2d, 0.0, DEFAULT_MASK_VALUE).astype(jnp.float32)

    o = flash_attention(q, k, v, bias, scale=1.0 / math.sqrt(D))    # (B*H, S, D)
    o = o.reshape(B, n_heads, S, D).transpose(0, 2, 1, 3).reshape(B * S, E)

    # Output projection.
    y = matmul_pallas(o.astype(cdt), w_proj.T.astype(cdt), out_dtype=x.dtype)
    return y.reshape(B, S, E)


# ---------------------------------------------------------------------------
# Pure-JAX reference (true-f32 precision) and test harness.
# ---------------------------------------------------------------------------
def reference_attention(x, w_attn, w_proj, rope, mask, *, n_heads):
    B, S, E = x.shape
    D = E // n_heads
    hp = jax.lax.Precision.HIGHEST
    qkv = jnp.matmul(x, w_attn.T, precision=hp)
    q, k, v = jnp.split(qkv, 3, axis=-1)
    q = _apply_rope(q.reshape(B, S, n_heads, D), rope)
    k = _apply_rope(k.reshape(B, S, n_heads, D), rope)
    v = v.reshape(B, S, n_heads, D)
    q = jnp.transpose(q, (0, 2, 1, 3))
    k = jnp.transpose(k, (0, 2, 1, 3))
    v = jnp.transpose(v, (0, 2, 1, 3))
    scores = jnp.matmul(q, jnp.swapaxes(k, -1, -2), precision=hp) / math.sqrt(D)
    mask2d = jnp.reshape(mask, mask.shape[-2:])
    scores = jnp.where(mask2d[None, None], scores, -jnp.inf)
    p = jax.nn.softmax(scores, axis=-1)
    y = jnp.matmul(p, v, precision=hp)
    y = jnp.transpose(y, (0, 2, 1, 3)).reshape(B, S, E)
    return jnp.matmul(y, w_proj.T, precision=hp)


def build_rope_cache(seq_len, head_dim, base=10000.0):
    theta = 1.0 / (base ** (jnp.arange(0, head_dim, 2, dtype=jnp.float32) / head_dim))
    t = jnp.arange(seq_len, dtype=jnp.float32)
    freqs = jnp.outer(t, theta)                                   # (S, D/2)
    return jnp.stack([jnp.cos(freqs), jnp.sin(freqs)], axis=-1)   # (S, D/2, 2)


def rel_err(a, b):
    a = jnp.asarray(a, jnp.float32)
    b = jnp.asarray(b, jnp.float32)
    return float(jnp.linalg.norm(a - b) / (jnp.linalg.norm(b) + 1e-30))


if __name__ == "__main__":
    # Small LLaMA-ish config: n_embed=128, n_heads=4 -> head_dim=32.
    batch, seq = 2, 8
    n_heads = 4
    n_embed = 128
    head_dim = n_embed // n_heads

    key = jax.random.PRNGKey(0)
    kx, kw1, kw2 = jax.random.split(key, 3)
    x = jax.random.normal(kx, (batch, seq, n_embed), dtype=jnp.float32)
    # Linear weight shapes: (out_features, in_features), bias=False.
    w_attn = jax.random.normal(kw1, (3 * n_embed, n_embed), dtype=jnp.float32) * 0.02
    w_proj = jax.random.normal(kw2, (n_embed, n_embed), dtype=jnp.float32) * 0.02

    rope = build_rope_cache(seq, head_dim)                          # (S, D/2, 2)
    mask = jnp.tril(jnp.ones((seq, seq), dtype=bool))[None, None]   # (1, 1, S, S) causal

    # f32 path.
    y = self_attention(x, w_attn, w_proj, rope, mask, n_heads=n_heads)
    y = jax.block_until_ready(y)
    y_ref = reference_attention(x, w_attn, w_proj, rope, mask, n_heads=n_heads)
    assert y.shape == (batch, seq, n_embed)
    e32 = rel_err(y, y_ref)
    assert e32 < 5e-3, f"f32 mismatch vs reference: rel_err={e32}"

    # bf16 MXU path (perf feedback): bf16 matmul inputs, f32 accumulation/softmax.
    y_bf16 = self_attention(x, w_attn, w_proj, rope, mask, n_heads=n_heads,
                            compute_dtype=jnp.bfloat16)
    y_bf16 = jax.block_until_ready(y_bf16)
    e16 = rel_err(y_bf16, y_ref)
    assert e16 < 3e-2, f"bf16 mismatch vs reference: rel_err={e16}"

    print("KERNEL_OK")
</pallas_src>

<mosaic_0001>
module attributes {stable_mosaic.version = 11 : i64} {
  func.func @_matmul_kernel(%arg0: i32, %arg1: i32, %arg2: i32, %arg3: memref<16x128xf32, #tpu.memory_space<vmem>>, %arg4: memref<128x128xf32, #tpu.memory_space<vmem>>, %arg5: memref<16x128xf32, #tpu.memory_space<vmem>>, %arg6: memref<16x128xf32, #tpu.memory_space<vmem>>) attributes {dimension_semantics = [#tpu.dimension_semantics<parallel>, #tpu.dimension_semantics<parallel>, #tpu.dimension_semantics<arbitrary>], iteration_bounds = array<i64: 1, 3, 1>, scalar_prefetch = 0 : i64, scratch_operands = 1 : i64, tpu.core_type = #tpu.core_type<tc>, window_params = [{transform_indices = @transform_0, window_bounds = array<i64: 16, 128>}, {transform_indices = @transform_1, window_bounds = array<i64: 128, 128>}, {transform_indices = @transform_2, window_bounds = array<i64: 16, 128>}]} {
    %c0_i32 = arith.constant 0 : i32
    %0 = arith.cmpi eq, %arg2, %c0_i32 : i32
    %1 = arith.extui %0 : i1 to i32
    %c0_i32_0 = arith.constant 0 : i32
    %2 = arith.cmpi ne, %1, %c0_i32_0 : i32
    scf.if %2 {
      %cst_10 = arith.constant 0.000000e+00 : f32
      %12 = vector.broadcast %cst_10 : f32 to vector<16x128xf32>
      %c0_11 = arith.constant 0 : index
      %c0_12 = arith.constant 0 : index
      %13 = vector.load %arg6[%c0_11, %c0_12] : memref<16x128xf32, #tpu.memory_space<vmem>>, vector<16x128xf32>
      tpu.vector_store %arg6[%c0_11, %c0_12], %12 {strides = array<i32>} : memref<16x128xf32, #tpu.memory_space<vmem>>, vector<16x128xf32>,
    } else {
    }
    %c0 = arith.constant 0 : index
    %c0_1 = arith.constant 0 : index
    %3 = vector.load %arg6[%c0, %c0_1] : memref<16x128xf32, #tpu.memory_space<vmem>>, vector<16x128xf32>
    %c0_2 = arith.constant 0 : index
    %c0_3 = arith.constant 0 : index
    %4 = vector.load %arg3[%c0_2, %c0_3] : memref<16x128xf32, #tpu.memory_space<vmem>>, vector<16x128xf32>
    %c0_4 = arith.constant 0 : index
    %c0_5 = arith.constant 0 : index
    %5 = vector.load %arg4[%c0_4, %c0_5] : memref<128x128xf32, #tpu.memory_space<vmem>>, vector<128x128xf32>
    %cst = arith.constant dense<0.000000e+00> : vector<16x128xf32>
    %6 = tpu.matmul %4, %5, %cst {dimension_numbers = #tpu.dot_dimension_numbers<[1], [0], [0], [1], [0, 0, 1, 1], [], []>} : vector<16x128xf32>, vector<128x128xf32>, vector<16x128xf32> -> vector<16x128xf32>
    %7 = arith.addf %3, %6 : vector<16x128xf32>
    %c0_6 = arith.constant 0 : index
    %c0_7 = arith.constant 0 : index
    %8 = vector.load %arg6[%c0_6, %c0_7] : memref<16x128xf32, #tpu.memory_space<vmem>>, vector<16x128xf32>
    tpu.vector_store %arg6[%c0_6, %c0_7], %7 {strides = array<i32>} : memref<16x128xf32, #tpu.memory_space<vmem>>, vector<16x128xf32>,
    %c0_i32_8 = arith.constant 0 : i32
    %9 = arith.cmpi eq, %arg2, %c0_i32_8 : i32
    %10 = arith.extui %9 : i1 to i32
    %c0_i32_9 = arith.constant 0 : i32
    %11 = arith.cmpi ne, %10, %c0_i32_9 : i32
    scf.if %11 {
      %c0_10 = arith.constant 0 : index
      %c0_11 = arith.constant 0 : index
      %12 = vector.load %arg6[%c0_10, %c0_11] : memref<16x128xf32, #tpu.memory_space<vmem>>, vector<16x128xf32>
      %c0_12 = arith.constant 0 : index
      %c0_13 = arith.constant 0 : index
      %13 = vector.load %arg5[%c0_12, %c0_13] : memref<16x128xf32, #tpu.memory_space<vmem>>, vector<16x128xf32>
      tpu.vector_store %arg5[%c0_12, %c0_13], %12 {strides = array<i32>} : memref<16x128xf32, #tpu.memory_space<vmem>>, vector<16x128xf32>,
    } else {
    }
    return
  }
  func.func @transform_0(%arg0: i32, %arg1: i32, %arg2: i32) -> (i32, i32) {
    %c0_i32 = arith.constant 0 : i32
    return %arg0, %arg2 : i32, i32
  }
  func.func @transform_1(%arg0: i32, %arg1: i32, %arg2: i32) -> (i32, i32) {
    %c0_i32 = arith.constant 0 : i32
    return %arg2, %arg1 : i32, i32
  }
  func.func @transform_2(%arg0: i32, %arg1: i32, %arg2: i32) -> (i32, i32) {
    %c0_i32 = arith.constant 0 : i32
    return %arg0, %arg1 : i32, i32
  }
}

module attributes {stable_mosaic.version = 11 : i64} {
  func.func @_attention_kernel(%arg0: i32, %arg1: i32, %arg2: i32, %arg3: memref<1x8x32xf32, #tpu.memory_space<vmem>>, %arg4: memref<1x8x32xf32, #tpu.memory_space<vmem>>, %arg5: memref<1x8x32xf32, #tpu.memory_space<vmem>>, %arg6: memref<8x8xf32, #tpu.memory_space<vmem>>, %arg7: memref<1x8x32xf32, #tpu.memory_space<vmem>>, %arg8: memref<8x1xf32, #tpu.memory_space<vmem>>, %arg9: memref<8x1xf32, #tpu.memory_space<vmem>>, %arg10: memref<8x32xf32, #tpu.memory_space<vmem>>) attributes {dimension_semantics = [#tpu.dimension_semantics<parallel>, #tpu.dimension_semantics<parallel>, #tpu.dimension_semantics<arbitrary>], iteration_bounds = array<i64: 8, 1, 1>, scalar_prefetch = 0 : i64, scratch_operands = 3 : i64, tpu.core_type = #tpu.core_type<tc>, window_params = [{transform_indices = @transform_0, window_bounds = array<i64: 1, 8, 32>}, {transform_indices = @transform_1, window_bounds = array<i64: 1, 8, 32>}, {transform_indices = @transform_2, window_bounds = array<i64: 1, 8, 32>}, {transform_indices = @transform_3, window_bounds = array<i64: 8, 8>}, {transform_indices = @transform_4, window_bounds = array<i64: 1, 8, 32>}]} {
    %c0_i32 = arith.constant 0 : i32
    %0 = arith.cmpi eq, %arg2, %c0_i32 : i32
    %1 = arith.extui %0 : i1 to i32
    %c0_i32_0 = arith.constant 0 : i32
    %2 = arith.cmpi ne, %1, %c0_i32_0 : i32
    scf.if %2 {
      %cst_29 = arith.constant -2.38197633E+38 : f32
      %39 = vector.broadcast %cst_29 : f32 to vector<8x1xf32>
      %c0_30 = arith.constant 0 : index
      %c0_31 = arith.constant 0 : index
      %40 = vector.load %arg8[%c0_30, %c0_31] : memref<8x1xf32, #tpu.memory_space<vmem>>, vector<8x1xf32>
      tpu.vector_store %arg8[%c0_30, %c0_31], %39 {strides = array<i32>} : memref<8x1xf32, #tpu.memory_space<vmem>>, vector<8x1xf32>,
      %cst_32 = arith.constant 0.000000e+00 : f32
      %41 = vector.broadcast %cst_32 : f32 to vector<8x1xf32>
      %c0_33 = arith.constant 0 : index
      %c0_34 = arith.constant 0 : index
      %42 = vector.load %arg9[%c0_33, %c0_34] : memref<8x1xf32, #tpu.memory_space<vmem>>, vector<8x1xf32>
      tpu.vector_store %arg9[%c0_33, %c0_34], %41 {strides = array<i32>} : memref<8x1xf32, #tpu.memory_space<vmem>>, vector<8x1xf32>,
      %cst_35 = arith.constant 0.000000e+00 : f32
      %43 = vector.broadcast %cst_35 : f32 to vector<8x32xf32>
      %c0_36 = arith.constant 0 : index
      %c0_37 = arith.constant 0 : index
      %44 = vector.load %arg10[%c0_36, %c0_37] : memref<8x32xf32, #tpu.memory_space<vmem>>, vector<8x32xf32>
      tpu.vector_store %arg10[%c0_36, %c0_37], %43 {strides = array<i32>} : memref<8x32xf32, #tpu.memory_space<vmem>>, vector<8x32xf32>,
    } else {
    }
    %c0 = arith.constant 0 : index
    %c0_1 = arith.constant 0 : index
    %c0_2 = arith.constant 0 : index
    %3 = vector.load %arg3[%c0, %c0_1, %c0_2] : memref<1x8x32xf32, #tpu.memory_space<vmem>>, vector<1x8x32xf32>
    %4 = vector.shape_cast %3 : vector<1x8x32xf32> to vector<8x32xf32>
    %c0_3 = arith.constant 0 : index
    %c0_4 = arith.constant 0 : index
    %c0_5 = arith.constant 0 : index
    %5 = vector.load %arg4[%c0_3, %c0_4, %c0_5] : memref<1x8x32xf32, #tpu.memory_space<vmem>>, vector<1x8x32xf32>
    %6 = vector.shape_cast %5 : vector<1x8x32xf32> to vector<8x32xf32>
    %c0_6 = arith.constant 0 : index
    %c0_7 = arith.constant 0 : index
    %c0_8 = arith.constant 0 : index
    %7 = vector.load %arg5[%c0_6, %c0_7, %c0_8] : memref<1x8x32xf32, #tpu.memory_space<vmem>>, vector<1x8x32xf32>
    %8 = vector.shape_cast %7 : vector<1x8x32xf32> to vector<8x32xf32>
    %cst = arith.constant dense<0.000000e+00> : vector<8x8xf32>
    %9 = tpu.matmul %4, %6, %cst {dimension_numbers = #tpu.dot_dimension_numbers<[1], [1], [0], [0], [0, 0, 1, 0], [], []>} : vector<8x32xf32>, vector<8x32xf32>, vector<8x8xf32> -> vector<8x8xf32>
    %cst_9 = arith.constant 0.176776692 : f32
    %10 = vector.broadcast %cst_9 : f32 to vector<8x8xf32>
    %11 = arith.mulf %9, %10 : vector<8x8xf32>
    %c0_10 = arith.constant 0 : index
    %c0_11 = arith.constant 0 : index
    %12 = vector.load %arg6[%c0_10, %c0_11] : memref<8x8xf32, #tpu.memory_space<vmem>>, vector<8x8xf32>
    %13 = arith.addf %11, %12 : vector<8x8xf32>
    %c0_12 = arith.constant 0 : index
    %c0_13 = arith.constant 0 : index
    %14 = vector.load %arg8[%c0_12, %c0_13] : memref<8x1xf32, #tpu.memory_space<vmem>>, vector<8x1xf32>
    %cst_14 = arith.constant dense<0xFF800000> : vector<8xf32>
    %15 = vector.multi_reduction <maximumf>, %13, %cst_14 [1] : vector<8x8xf32> to vector<8xf32>
    %16 = vector.shape_cast %15 : vector<8xf32> to vector<8x1xf32>
    %17 = arith.maximumf %14, %16 : vector<8x1xf32>
    %18 = arith.subf %14, %17 : vector<8x1xf32>
    %19 = math.exp %18 : vector<8x1xf32>
    %20 = vector.broadcast %17 : vector<8x1xf32> to vector<8x8xf32>
    %21 = arith.subf %13, %20 : vector<8x8xf32>
    %22 = math.exp %21 : vector<8x8xf32>
    %c0_15 = arith.constant 0 : index
    %c0_16 = arith.constant 0 : index
    %23 = vector.load %arg9[%c0_15, %c0_16] : memref<8x1xf32, #tpu.memory_space<vmem>>, vector<8x1xf32>
    %24 = arith.mulf %19, %23 : vector<8x1xf32>
    %cst_17 = arith.constant dense<0.000000e+00> : vector<8xf32>
    %25 = vector.multi_reduction <add>, %22, %cst_17 [1] : vector<8x8xf32> to vector<8xf32>
    %26 = vector.shape_cast %25 : vector<8xf32> to vector<8x1xf32>
    %27 = arith.addf %24, %26 : vector<8x1xf32>
    %c0_18 = arith.constant 0 : index
    %c0_19 = arith.constant 0 : index
    %28 = vector.load %arg9[%c0_18, %c0_19] : memref<8x1xf32, #tpu.memory_space<vmem>>, vector<8x1xf32>
    tpu.vector_store %arg9[%c0_18, %c0_19], %27 {strides = array<i32>} : memref<8x1xf32, #tpu.memory_space<vmem>>, vector<8x1xf32>,
    %c0_20 = arith.constant 0 : index
    %c0_21 = arith.constant 0 : index
    %29 = vector.load %arg10[%c0_20, %c0_21] : memref<8x32xf32, #tpu.memory_space<vmem>>, vector<8x32xf32>
    %30 = vector.broadcast %19 : vector<8x1xf32> to vector<8x32xf32>
    %31 = arith.mulf %30, %29 : vector<8x32xf32>
    %cst_22 = arith.constant dense<0.000000e+00> : vector<8x32xf32>
    %32 = tpu.matmul %22, %8, %cst_22 {dimension_numbers = #tpu.dot_dimension_numbers<[1], [0], [0], [1], [0, 0, 1, 1], [], []>} : vector<8x8xf32>, vector<8x32xf32>, vector<8x32xf32> -> vector<8x32xf32>
    %33 = arith.addf %31, %32 : vector<8x32xf32>
    %c0_23 = arith.constant 0 : index
    %c0_24 = arith.constant 0 : index
    %34 = vector.load %arg10[%c0_23, %c0_24] : memref<8x32xf32, #tpu.memory_space<vmem>>, vector<8x32xf32>
    tpu.vector_store %arg10[%c0_23, %c0_24], %33 {strides = array<i32>} : memref<8x32xf32, #tpu.memory_space<vmem>>, vector<8x32xf32>,
    %c0_25 = arith.constant 0 : index
    %c0_26 = arith.constant 0 : index
    %35 = vector.load %arg8[%c0_25, %c0_26] : memref<8x1xf32, #tpu.memory_space<vmem>>, vector<8x1xf32>
    tpu.vector_store %arg8[%c0_25, %c0_26], %17 {strides = array<i32>} : memref<8x1xf32, #tpu.memory_space<vmem>>, vector<8x1xf32>,
    %c0_i32_27 = arith.constant 0 : i32
    %36 = arith.cmpi eq, %arg2, %c0_i32_27 : i32
    %37 = arith.extui %36 : i1 to i32
    %c0_i32_28 = arith.constant 0 : i32
    %38 = arith.cmpi ne, %37, %c0_i32_28 : i32
    scf.if %38 {
      %c0_29 = arith.constant 0 : index
      %c0_30 = arith.constant 0 : index
      %39 = vector.load %arg10[%c0_29, %c0_30] : memref<8x32xf32, #tpu.memory_space<vmem>>, vector<8x32xf32>
      %c0_31 = arith.constant 0 : index
      %c0_32 = arith.constant 0 : index
      %40 = vector.load %arg9[%c0_31, %c0_32] : memref<8x1xf32, #tpu.memory_space<vmem>>, vector<8x1xf32>
      %41 = vector.broadcast %40 : vector<8x1xf32> to vector<8x32xf32>
      %42 = arith.divf %39, %41 : vector<8x32xf32>
      %c0_33 = arith.constant 0 : index
      %c0_34 = arith.constant 0 : index
      %c0_35 = arith.constant 0 : index
      %43 = vector.load %arg7[%c0_33, %c0_34, %c0_35] : memref<1x8x32xf32, #tpu.memory_space<vmem>>, vector<1x8x32xf32>
      %44 = vector.shape_cast %43 : vector<1x8x32xf32> to vector<8x32xf32>
      %45 = vector.shape_cast %42 : vector<8x32xf32> to vector<1x8x32xf32>
      tpu.vector_store %arg7[%c0_33, %c0_34, %c0_35], %45 {strides = array<i32>} : memref<1x8x32xf32, #tpu.memory_space<vmem>>, vector<1x8x32xf32>,
    } else {
    }
    return
  }
  func.func @transform_0(%arg0: i32, %arg1: i32, %arg2: i32) -> (i32, i32, i32) {
    %c0_i32 = arith.constant 0 : i32
    %c0_i32_0 = arith.constant 0 : i32
    return %arg0, %arg1, %c0_i32 : i32, i32, i32
  }
  func.func @transform_1(%arg0: i32, %arg1: i32, %arg2: i32) -> (i32, i32, i32) {
    %c0_i32 = arith.constant 0 : i32
    %c0_i32_0 = arith.constant 0 : i32
    return %arg0, %arg2, %c0_i32 : i32, i32, i32
  }
  func.func @transform_2(%arg0: i32, %arg1: i32, %arg2: i32) -> (i32, i32, i32) {
    %c0_i32 = arith.constant 0 : i32
    %c0_i32_0 = arith.constant 0 : i32
    return %arg0, %arg2, %c0_i32 : i32, i32, i32
  }
  func.func @transform_3(%arg0: i32, %arg1: i32, %arg2: i32) -> (i32, i32) {
    %c0_i32 = arith.constant 0 : i32
    return %arg1, %arg2 : i32, i32
  }
  func.func @transform_4(%arg0: i32, %arg1: i32, %arg2: i32) -> (i32, i32, i32) {
    %c0_i32 = arith.constant 0 : i32
    %c0_i32_0 = arith.constant 0 : i32
    return %arg0, %arg1, %c0_i32 : i32, i32, i32
  }
}

module attributes {stable_mosaic.version = 11 : i64} {
  func.func @_matmul_kernel(%arg0: i32, %arg1: i32, %arg2: i32, %arg3: memref<16x128xf32, #tpu.memory_space<vmem>>, %arg4: memref<128x128xf32, #tpu.memory_space<vmem>>, %arg5: memref<16x128xf32, #tpu.memory_space<vmem>>, %arg6: memref<16x128xf32, #tpu.memory_space<vmem>>) attributes {dimension_semantics = [#tpu.dimension_semantics<parallel>, #tpu.dimension_semantics<parallel>, #tpu.dimension_semantics<arbitrary>], iteration_bounds = array<i64: 1, 1, 1>, scalar_prefetch = 0 : i64, scratch_operands = 1 : i64, tpu.core_type = #tpu.core_type<tc>, window_params = [{transform_indices = @transform_0, window_bounds = array<i64: 16, 128>}, {transform_indices = @transform_1, window_bounds = array<i64: 128, 128>}, {transform_indices = @transform_2, window_bounds = array<i64: 16, 128>}]} {
    %c0_i32 = arith.constant 0 : i32
    %0 = arith.cmpi eq, %arg2, %c0_i32 : i32
    %1 = arith.extui %0 : i1 to i32
    %c0_i32_0 = arith.constant 0 : i32
    %2 = arith.cmpi ne, %1, %c0_i32_0 : i32
    scf.if %2 {
      %cst_10 = arith.constant 0.000000e+00 : f32
      %12 = vector.broadcast %cst_10 : f32 to vector<16x128xf32>
      %c0_11 = arith.constant 0 : index
      %c0_12 = arith.constant 0 : index
      %13 = vector.load %arg6[%c0_11, %c0_12] : memref<16x128xf32, #tpu.memory_space<vmem>>, vector<16x128xf32>
      tpu.vector_store %arg6[%c0_11, %c0_12], %12 {strides = array<i32>} : memref<16x128xf32, #tpu.memory_space<vmem>>, vector<16x128xf32>,
    } else {
    }
    %c0 = arith.constant 0 : index
    %c0_1 = arith.constant 0 : index
    %3 = vector.load %arg6[%c0, %c0_1] : memref<16x128xf32, #tpu.memory_space<vmem>>, vector<16x128xf32>
    %c0_2 = arith.constant 0 : index
    %c0_3 = arith.constant 0 : index
    %4 = vector.load %arg3[%c0_2, %c0_3] : memref<16x128xf32, #tpu.memory_space<vmem>>, vector<16x128xf32>
    %c0_4 = arith.constant 0 : index
    %c0_5 = arith.constant 0 : index
    %5 = vector.load %arg4[%c0_4, %c0_5] : memref<128x128xf32, #tpu.memory_space<vmem>>, vector<128x128xf32>
    %cst = arith.constant dense<0.000000e+00> : vector<16x128xf32>
    %6 = tpu.matmul %4, %5, %cst {dimension_numbers = #tpu.dot_dimension_numbers<[1], [0], [0], [1], [0, 0, 1, 1], [], []>} : vector<16x128xf32>, vector<128x128xf32>, vector<16x128xf32> -> vector<16x128xf32>
    %7 = arith.addf %3, %6 : vector<16x128xf32>
    %c0_6 = arith.constant 0 : index
    %c0_7 = arith.constant 0 : index
    %8 = vector.load %arg6[%c0_6, %c0_7] : memref<16x128xf32, #tpu.memory_space<vmem>>, vector<16x128xf32>
    tpu.vector_store %arg6[%c0_6, %c0_7], %7 {strides = array<i32>} : memref<16x128xf32, #tpu.memory_space<vmem>>, vector<16x128xf32>,
    %c0_i32_8 = arith.constant 0 : i32
    %9 = arith.cmpi eq, %arg2, %c0_i32_8 : i32
    %10 = arith.extui %9 : i1 to i32
    %c0_i32_9 = arith.constant 0 : i32
    %11 = arith.cmpi ne, %10, %c0_i32_9 : i32
    scf.if %11 {
      %c0_10 = arith.constant 0 : index
      %c0_11 = arith.constant 0 : index
      %12 = vector.load %arg6[%c0_10, %c0_11] : memref<16x128xf32, #tpu.memory_space<vmem>>, vector<16x128xf32>
      %c0_12 = arith.constant 0 : index
      %c0_13 = arith.constant 0 : index
      %13 = vector.load %arg5[%c0_12, %c0_13] : memref<16x128xf32, #tpu.memory_space<vmem>>, vector<16x128xf32>
      tpu.vector_store %arg5[%c0_12, %c0_13], %12 {strides = array<i32>} : memref<16x128xf32, #tpu.memory_space<vmem>>, vector<16x128xf32>,
    } else {
    }
    return
  }
  func.func @transform_0(%arg0: i32, %arg1: i32, %arg2: i32) -> (i32, i32) {
    %c0_i32 = arith.constant 0 : i32
    return %arg0, %arg2 : i32, i32
  }
  func.func @transform_1(%arg0: i32, %arg1: i32, %arg2: i32) -> (i32, i32) {
    %c0_i32 = arith.constant 0 : i32
    return %arg2, %arg1 : i32, i32
  }
  func.func @transform_2(%arg0: i32, %arg1: i32, %arg2: i32) -> (i32, i32) {
    %c0_i32 = arith.constant 0 : i32
    return %arg0, %arg1 : i32, i32
  }
}

</mosaic_0001>

<bundles_post_ra>
// kernel: self_attention.3
= control target key start
LH: loop header
LB: loop body
LE: loop exit
PB: predicated region body
PF: predicated region fallthrough
CT: control target
= control target key end

     0   :  { %s737_s9 = smov 0   ;;  %s739_s10 = smov 0   ;;  %s855_s0 = inlined_call_operand.vmem [shape: f32[16,128], index: 0, kind: input, shape index: {}]   ;;  %s856_s1 = inlined_call_operand.vmem [shape: f32[128,384], index: 1, kind: input, shape index: {}]   ;;  %s857_s2 = inlined_call_operand.vmem [shape: f32[16,384], index: 2, kind: output, shape index: {}]  }
   0x1   :  { %s741_s11 = smov 0   ;;  %s743_s12 = smov 0  }
   0x2   :  { %s745_s13 = smov 0  }
   0x3 LB: > { %s27_s14 = sadd.s32 1, %s716_s12  ;;  %s543_s15 = sadd.s32 4294967295, %s720_s13   ;;  %s720_s13 = sphi %s745_s13, %s12_s13   ;;  %s716_s12 = sphi %s743_s12, %s862_s12   ;;  %s712_s11 = sphi %s741_s11, %s861_s11   ;;  %s708_s10 = sphi %s739_s10, %s860_s10   ;;  %s704_s9 = sphi %s737_s9, %s859_s9  }
   0x4   : > { %p29_p0 = scmp.ge.s32.totalorder %s27_s14, 3  ;;  %p75_p1 = scmp.ne.s32.totalorder %s708_s10, %s704_s9 }
   0x5   : > { %p76_p2 = scmp.eq.s32.totalorder %s720_s13, 0  ;;  %p107_p4 = scmp.eq.s32.totalorder %s543_s15, 2 }
   0x6   : > { %s864_s14 = smov (%p29_p0, %s27_s14), 0  ;;  %s68_s17 = sadd.s32 1, %s708_s10 }
   0x7   : > { %p77_p3 = por %p76_p2, %p75_p1  ;;  %s64_s16 = ssub.s32 %s716_s12, %s864_s14 }
   0x8   : > { %p66_p5 = scmp.eq.s32.totalorder %s64_s16, 0  ;;  %p772_p6 = por %p107_p4, %p75_p1 }
   0x9   : > { %p547_p7 = scmp.ge.s32.totalorder %s720_s13, 3 }
   0xa   : > { %s777_s19 = scalar_select %p66_p5, %s708_s10, %s68_s17  }
   0xb   : > { %141 = sbr.rel (%p547_p7) target bundleno = 30 (0x1e), region = 20 }
  0x12   : > { %144 = sbr.rel (!%p77_p3) target bundleno = 30 (0x1e), region = 24  ;;  %s146_s20 = sand.u32 (%p77_p3), 1, %s708_s10  }
  0x13   : > { %s549_s21 = sshll.u32 (%p77_p3), %s716_s12, 3  ;;  %s548_s22 = sshll.u32 (%p77_p3), %s146_s20, 7 }
  0x14   : > { %s785_s25 = scalar_lea.vmem (%p77_p3), %s856_s1, %s549_s21  ;;  %s148_s26 = scalar_lea.vmem (%p77_p3), [#allocation3], %s548_s22 }
  0x15   : > { %v211_v0 = vld [vmem:[%s785_s25] sm:$0xff] (%p77_p3)  ;;  %v213_v1 = vld [vmem:[%s785_s25 + $0x18] sm:$0xff] (%p77_p3)  ;;  %v215_v2 = vld [vmem:[%s785_s25 + $0x30] sm:$0xff] (%p77_p3) }
  0x16   : > { %212 = vst [vmem:[%s148_s26] sm:$0xff] (%p77_p3), %v211_v0  ;;  %214 = vst [vmem:[%s148_s26 + $0x8] sm:$0xff] (%p77_p3), %v213_v1  ;;  %v217_v3 = vld [vmem:[%s785_s25 + $0x48] sm:$0xff] (%p77_p3)  ;;  %v219_v4 = vld [vmem:[%s785_s25 + $0x60] sm:$0xff] (%p77_p3) }
  0x17   : > { %216 = vst [vmem:[%s148_s26 + $0x10] sm:$0xff] (%p77_p3), %v215_v2  ;;  %v221_v5 = vld [vmem:[%s785_s25 + $0x78] sm:$0xff] (%p77_p3)  ;;  %218 = vst [vmem:[%s148_s26 + $0x18] sm:$0xff] (%p77_p3), %v217_v3  ;;  %v223_v6 = vld [vmem:[%s785_s25 + $0x90] sm:$0xff] (%p77_p3) }
  0x18   : > { %220 = vst [vmem:[%s148_s26 + $0x20] sm:$0xff] (%p77_p3), %v219_v4  ;;  %222 = vst [vmem:[%s148_s26 + $0x28] sm:$0xff] (%p77_p3), %v221_v5  ;;  %v225_v7 = vld [vmem:[%s785_s25 + $0xa8] sm:$0xff] (%p77_p3)  ;;  %v227_v8 = vld [vmem:[%s785_s25 + $0xc0] sm:$0xff] (%p77_p3) }
  0x19   : > { %224 = vst [vmem:[%s148_s26 + $0x30] sm:$0xff] %v223_v6  ;;  %226 = vst [vmem:[%s148_s26 + $0x38] sm:$0xff] %v225_v7  ;;  %v229_v9 = vld [vmem:[%s785_s25 + $0xd8] sm:$0xff]  ;;  %v231_v10 = vld [vmem:[%s785_s25 + $0xf0] sm:$0xff] }
  0x1a   : > { %228 = vst [vmem:[%s148_s26 + $0x40] sm:$0xff] %v227_v8  ;;  %v233_v11 = vld [vmem:[%s785_s25 + $0x108] sm:$0xff]  ;;  %230 = vst [vmem:[%s148_s26 + $0x48] sm:$0xff] %v229_v9  ;;  %v235_v12 = vld [vmem:[%s785_s25 + $0x120] sm:$0xff] }
  0x1b   : > { %232 = vst [vmem:[%s148_s26 + $0x50] sm:$0xff] %v231_v10  ;;  %234 = vst [vmem:[%s148_s26 + $0x58] sm:$0xff] %v233_v11  ;;  %v237_v13 = vld [vmem:[%s785_s25 + $0x138] sm:$0xff]  ;;  %v239_v14 = vld [vmem:[%s785_s25 + $0x150] sm:$0xff] }
  0x1c   : > { %236 = vst [vmem:[%s148_s26 + $0x60] sm:$0xff] %v235_v12  ;;  %238 = vst [vmem:[%s148_s26 + $0x68] sm:$0xff] %v237_v13  ;;  %v241_v15 = vld [vmem:[%s785_s25 + $0x168] sm:$0xff] }
  0x1d   : > { %240 = vst [vmem:[%s148_s26 + $0x70] sm:$0xff] %v239_v14  ;;  %242 = vst [vmem:[%s148_s26 + $0x78] sm:$0xff] %v241_v15 }
  0x1e PF: > { %p550_p8 = scmp.ge.s32.totalorder %s720_s13, 1  ;;  %p247_p9 = scmp.lt.s32.totalorder %s720_s13, 4 }
  0x20   : > { %p248_p10 = pnand %p550_p8, %p247_p9 }
  0x21   : > { %s254_s27 = sand.u32 (!%p248_p10), 1, %s704_s9   ;;  %v301_v16 = vld [vmem:[%s855_s0] sm:$0xff] (!%p248_p10)  ;;  %v302_v41 = vld [vmem:[%s855_s0 + $0x8] sm:$0xff] (!%p248_p10) }
  0x22   : > { %251 = sbr.rel (%p248_p10) target bundleno = 293 (0x125), region = 62  ;;  %s551_s30 = sshll.u32 (!%p248_p10), %s254_s27, 7  ;;  %607 = vmatprep.mubr.f32.mxu0 (!%p248_p10), %v301_v16 }
  0x23   : > { %s811_s3 = scalar_lea.vmem (!%p248_p10), [#allocation3], %s551_s30  ;;  %s552_s6 = sshll.u32 (!%p248_p10), %s254_s27, 4 }
  0x24   : > { %v303_v17 = vld [vmem:[%s811_s3] sm:$0xff] (!%p248_p10)  ;;  %v304_v18 = vld [vmem:[%s811_s3 + $0x8] sm:$0xff] (!%p248_p10)  ;;  %v305_v19 = vld [vmem:[%s811_s3 + $0x10] sm:$0xff] (!%p248_p10)  ;;  %s281_s7 = scalar_lea.vmem (!%p248_p10), [#allocation4], %s552_s6 }
  0x25   : > { %v610_v20 = vpack.c.bf16 (!%p248_p10), %v304_v18, %v303_v17  ;;  %v306_v21 = vld [vmem:[%s811_s3 + $0x18] sm:$0xff] (!%p248_p10)  ;;  %v307_v23 = vld [vmem:[%s811_s3 + $0x20] sm:$0xff] (!%p248_p10)  ;;  %v308_v24 = vld [vmem:[%s811_s3 + $0x28] sm:$0xff] (!%p248_p10) }
  0x26   : > { %v614_v22 = vpack.c.bf16 (!%p248_p10), %v306_v21, %v305_v19  ;;  %v618_v25 = vpack.c.bf16 (!%p248_p10), %v308_v24, %v307_v23  ;;  %v309_v26 = vld [vmem:[%s811_s3 + $0x30] sm:$0xff] (!%p248_p10)  ;;  %v310_v27 = vld [vmem:[%s811_s3 + $0x38] sm:$0xff] (!%p248_p10)  ;;  %v311_v29 = vld [vmem:[%s811_s3 + $0x40] sm:$0xff] (!%p248_p10) }
  0x27   : > { %611 = vmatprep.subr.bf16.mxu0 (!%p248_p10), %v610_v20  ;;  %v622_v28 = vpack.c.bf16 (!%p248_p10), %v310_v27, %v309_v26  ;;  %v312_v30 = vld [vmem:[%s811_s3 + $0x48] sm:$0xff] (!%p248_p10)  ;;  %v313_v32 = vld [vmem:[%s811_s3 + $0x50] sm:$0xff] (!%p248_p10)  ;;  %v314_v33 = vld [vmem:[%s811_s3 + $0x58] sm:$0xff] (!%p248_p10) }
  0x28   : > { %613 = vmatpush3.bf16.msra.mxu0 (!%p248_p10), %v610_v20  ;;  %v626_v31 = vpack.c.bf16 (!%p248_p10), %v312_v30, %v311_v29  ;;  %v630_v34 = vpack.c.bf16 (!%p248_p10), %v314_v33, %v313_v32  ;;  %v315_v35 = vld [vmem:[%s811_s3 + $0x60] sm:$0xff] (!%p248_p10)  ;;  %v316_v36 = vld [vmem:[%s811_s3 + $0x68] sm:$0xff] (!%p248_p10)  ;;  %v317_v38 = vld [vmem:[%s811_s3 + $0x70] sm:$0xff] (!%p248_p10) }
  0x29   : > { %615 = vmatprep.subr.bf16.mxu0 %v614_v22  ;;  %v634_v37 = vpack.c.bf16 %v316_v36, %v315_v35  ;;  %v318_v39 = vld [vmem:[%s811_s3 + $0x78] sm:$0xff]  ;;  %s554_s8 = sshll.u32 (%p772_p6), %s712_s11, 3 }
  0x2a   : > { %v638_v40 = vpack.c.bf16 %v318_v39, %v317_v38  ;;  %s416_s17 = scalar_lea.vmem (%p772_p6), %s857_s2, %s554_s8 }
  0x2c   : > { %617 = vmatpush3.bf16.msra.mxu0 %v614_v22 }
  0x2d   : > { %619 = vmatprep.subr.bf16.mxu0 %v618_v25 }
  0x30   : > { %621 = vmatpush3.bf16.msra.mxu0 %v618_v25 }
  0x31   : > { %623 = vmatprep.subr.bf16.mxu0 %v622_v28 }
  0x34   : > { %625 = vmatpush3.bf16.msra.mxu0 %v622_v28 }
  0x35   : > { %627 = vmatprep.subr.bf16.mxu0 %v626_v31 }
  0x38   : > { %629 = vmatpush3.bf16.msra.mxu0 %v626_v31 }
  0x39   : > { %631 = vmatprep.subr.bf16.mxu0 %v630_v34 }
  0x3c   : > { %633 = vmatpush3.bf16.msra.mxu0 %v630_v34 }
  0x3d   : > { %635 = vmatprep.subr.bf16.mxu0 %v634_v37 }
  0x40   : > { %637 = vmatpush3.bf16.msra.mxu0 %v634_v37 }
  0x41   : > { %639 = vmatprep.subr.bf16.mxu0 %v638_v40 }
  0x44   : > { %641 = vmatpush3.bf16.msra.mxu0 %v638_v40 }
  0x47   : > { %608 = vmatmul.mubr.f32.vlgmr.msra.gmra.mrb[0].mxu0 %v302_v41 }
 0x116   : > { %411 = sbr.rel (!%p772_p6) target bundleno = 293 (0x125), region = 78 }
 0x11a   : > { %v609_v42 = vpop.f32.mrb[0].mxu0 }
 0x11b   : > { %404 = vst [vmem:[%s281_s7 + $0x8] sm:$0xff] %v609_v42  ;;  %v385_v43 = vpop.f32.mrb[1].mxu0 }
 0x11c   : > { %403 = vst [vmem:[%s281_s7] sm:$0xff] %v385_v43 }
 0x122   : > { %v448_v45 = vld [vmem:[%s281_s7 + $0x8] sm:$0xff] }
 0x123   : > { %v446_v44 = vld [vmem:[%s281_s7] sm:$0xff]  ;;  %449 = vst [vmem:[%s416_s17 + $0x18] sm:$0xff] %v448_v45 }
 0x124   : > { %447 = vst [vmem:[%s416_s17] sm:$0xff] %v446_v44 }
 0x125 PF: > { %s12_s13 = sadd.s32 1, %s720_s13   ;;  %s859_s9 = smov %s708_s10 }
 0x126   : > { %p9_p11 = scmp.ge.s32.totalorder %s12_s13, 5   ;;  %s860_s10 = smov %s777_s19 }
 0x127   : > { %s861_s11 = smov %s716_s12  ;;  %s862_s12 = smov %s864_s14 }
 0x128   :  { %11 = sbr.rel (!%p9_p11) target bundleno = 3 (0x3), region = 150 }

// kernel: self_attention.4
= control target key start
LH: loop header
LB: loop body
LE: loop exit
PB: predicated region body
PF: predicated region fallthrough
CT: control target
= control target key end

     0   :  { %s772_s15 = smov 0   ;;  %s774_s16 = smov 0   ;;  %s832_s0 = inlined_call_operand.vmem [shape: f32[8,8,32], index: 0, kind: input, shape index: {}]   ;;  %s833_s1 = inlined_call_operand.vmem [shape: f32[8,8,32], index: 1, kind: input, shape index: {}]   ;;  %s834_s2 = inlined_call_operand.vmem [shape: f32[8,8,32], index: 2, kind: input, shape index: {}]   ;;  %s835_s3 = inlined_call_operand.vmem [shape: f32[8,8], index: 3, kind: input, shape index: {}]   ;;  %s836_s4 = inlined_call_operand.vmem [shape: f32[8,8,32], index: 4, kind: output, shape index: {}]  }
   0x1   :  { %s776_s17 = smov 0  }
   0x2 LB: > { %s33_s18 = sadd.s32 1, %s737_s16  ;;  %p659_p0 = scmp.ge.s32.totalorder %s741_s17, 1  ;;  %s741_s17 = sphi %s776_s17, %s14_s17   ;;  %s737_s16 = sphi %s774_s16, %s838_s16   ;;  %s733_s15 = sphi %s772_s15, %s837_s15  }
   0x3   : > { %p35_p1 = scmp.ge.s32.totalorder %s33_s18, 8  ;;  %p229_p2 = scmp.lt.s32.totalorder %s741_s17, 9 }
   0x5   : > { %s840_s18 = smov (%p35_p1, %s33_s18), 0  ;;  %p230_p3 = pnand %p659_p0, %p229_p2 }
   0x6   : > { %p280_p4 = scmp.lt.s32.totalorder (!%p230_p3), %s733_s15, 7  ;;  %vm322_vm0 = vcmask (!%p230_p3), 261120   ;;  %v743_v0 = vmov (!%p230_p3), 0.0   ;;  %vm744_vm1 = vmmov (!%p230_p3), 0   ;;  %vm319_vm2 = vcmask (!%p230_p3), 7168   ;;  %v405_v5 = vld [vmem:[%s835_s3] sm:$0xff] (!%p230_p3) }
   0x7   : > { %233 = sbr.rel (%p230_p3) target bundleno = 820 (0x334), region = 36  ;;  %673 = vmatprep.subr.mxu0 (!%p230_p3), %v743_v0  ;;  %323 = vst.msk [vmem:[#allocation4] sm:$0xff] (!%p230_p3), %vm322_vm0, %v743_v0  ;;  %675 = vmatprep.mubr.msk.f32.mxu0 (!%p230_p3), %vm744_vm1, %v743_v0  ;;  %v745_v3 = vmov (!%p230_p3), -2.3819763e+38   ;;  %vm408_vm3 = vcmask (!%p230_p3), 64512   ;;  %v746_v10 = vmov (!%p230_p3), 0  }
   0x8   : > { %678 = vmatprep.subr.mxu1 (!%p230_p3), %v743_v0  ;;  %680 = vmatprep.mubr.msk.f32.mxu1 (!%p230_p3), %vm744_vm1, %v743_v0  ;;  %320 = vst.msk [vmem:[#allocation2] sm:$0xff] (!%p230_p3), %vm319_vm2, %v745_v3  ;;  %321 = vst.msk [vmem:[#allocation3] sm:$0xff] (!%p230_p3), %vm319_vm2, %v743_v0 }
   0x9   : > { %711 = vset.pattern.permute.xlu0 (!%p230_p3), %v746_v10  ;;  %712 = vset.pattern.permute.xlu1 (!%p230_p3), %v746_v10 }
   0xe   : > { %s842_s15 = smov (!%p280_p4, %s733_s15), 7  ;;  %v432_v28 = vld [vmem:[#allocation4] sm:$0xff] }
   0xf   : > { %s791_s19 = sshll.u32 %s842_s15, 3  ;;  %v407_v11 = vld [vmem:[#allocation2] sm:$0xff]  ;;  %v424_v23 = vld [vmem:[#allocation3] sm:$0xff] }
  0x10   : > { %s293_s22 = scalar_lea.vmem %s833_s1, %s791_s19  ;;  %s286_s25 = scalar_lea.vmem %s832_s0, %s791_s19 }
  0x11   : > { %v325_v1 = vld [vmem:[%s293_s22] sm:$0xff]  ;;  %s300_s30 = scalar_lea.vmem %s834_s2, %s791_s19  ;;  %s314_s7 = scalar_lea.vmem %s836_s4, %s791_s19 }
  0x12   : > { %674 = vmatpush3.xpose.msk.msra.mxu0 %vm322_vm0, %v325_v1  ;;  %v324_v2 = vld [vmem:[%s286_s25] sm:$0xff] }
  0x13   : > { %v326_v15 = vld [vmem:[%s300_s30] sm:$0xff] }
  0x14   : > { %679 = vmatpush3.msra.mxu1 %v326_v15 }
  0x15   : > { %676 = vmatmul.mubr.msk.f32.vlgmr.msra.gmra.mrb[0].mxu0 %vm322_vm0, %v324_v2 }
  0xe8   : > { %v400_v4 = vpop.f32.mrb[0].mxu0 }
  0xe9   : > { %v404_v6 = vmul.f32 0.17677669, %v400_v4  ;;  %v677_v7 = vpop.f32.mrb[1].mxu0 }
  0xeb   : > { %v406_v8 = vadd.f32 %v405_v5, %v404_v6 }
  0xed   : > { %v409_v9 = vsel %vm408_vm3, %v406_v8, -inf }
  0xee   : > { %410 = vmax.xlane.f32.xlu0 %v409_v9 }
 0x17b   : > { %v411_v12 = vpop.xlane.xlu0 %410 }
 0x17c   : > { %v412_v13 = vmax.f32 %v407_v11, %v411_v12 }
 0x17e   : > { %v413_v14 = vsub.f32 %v407_v11, %v412_v13  ;;  %514 = vst.msk [vmem:[#allocation2] sm:$0xff] %vm319_vm2, %v412_v13  ;;  %418 = vperm.xlu0 %711, %v412_v13  }
 0x180   : > { %v414_v21 = vmul.f32 1.442695, %v413_v14 }
 0x1fd   : > { %v419_v16 = vpop.permute.xlu0 %418 }
 0x1fe   : > { %v421_v17 = vsub.f32 %v406_v8, %v419_v16 }
 0x200   : > { %v422_v18 = vmul.f32 1.442695, %v421_v17 }
 0x202   : > { %713 = vpow2.f32 %v422_v18 }
 0x203   : > { %715 = vpow2.f32 %v414_v21 }
 0x20c   : > { %v714_v19 = vpop.eup %713 }
 0x20d   : > { %681 = vmatmul.mubr.msk.f32.vlgmr.msra.gmra.mrb[0].mxu1 %vm408_vm3, %v714_v19  ;;  %v426_v20 = vsel %vm408_vm3, %v714_v19, 0.0  ;;  %v716_v22 = vpop.eup %715 }
 0x20e   : > { %427 = vadd.xlane.f32.xlu1 %v426_v20  ;;  %v425_v24 = vmul.f32 %v716_v22, %v424_v23 }
 0x21f   : > { %435 = vperm.xlu1 %712, %v716_v22  }
 0x29b   : > { %v428_v25 = vpop.xlane.xlu1 %427 }
 0x29c   : > { %v429_v26 = vadd.f32 %v428_v25, %v425_v24 }
 0x29e   : > { %431 = vst.msk [vmem:[#allocation3] sm:$0xff] %vm319_vm2, %v429_v26 }
 0x29f   : > { %v436_v29 = vpop.permute.xlu1 %435 }
 0x2a0   : > { %v438_v30 = vmul.f32 %v436_v29, %v432_v28 }
 0x2a5   : > { %v519_v27 = vld [vmem:[#allocation3] sm:$0xff] }
 0x2a6   : > { %522 = vperm.xlu1 %712, %v519_v27  }
 0x2e0   : > { %v508_v31 = vpop.f32.mrb[0].mxu1 }
 0x2e1   : > { %v512_v32 = vadd.f32 %v508_v31, %v438_v30  ;;  %v682_v33 = vpop.f32.mrb[1].mxu1 }
 0x2e3   : > { %513 = vst.msk [vmem:[#allocation4] sm:$0xff] %vm322_vm0, %v512_v32 }
 0x2ea   : > { %v518_v36 = vld [vmem:[#allocation4] sm:$0xff] }
 0x325   : > { %v523_v34 = vpop.permute.xlu1 %522 }
 0x326   : > { %717 = vrcp.f32 %v523_v34 }
 0x330   : > { %v718_v35 = vpop.eup %717 }
 0x331   : > { %v526_v37 = vmul.f32 %v718_v35, %v518_v36 }
 0x333   : > { %527 = vst.msk [vmem:[%s314_s7] sm:$0xff] %vm322_vm0, %v526_v37 }
 0x334 PF: > { %s14_s17 = sadd.s32 1, %s741_s17   ;;  %s837_s15 = smov %s737_s16 }
 0x335   : > { %p11_p5 = scmp.ge.s32.totalorder %s14_s17, 10   ;;  %s838_s16 = smov %s840_s18 }
 0x337   :  { %13 = sbr.rel (!%p11_p5) target bundleno = 2 (0x2), region = 83 }

// kernel: self_attention.5
= control target key start
LH: loop header
LB: loop body
LE: loop exit
PB: predicated region body
PF: predicated region fallthrough
CT: control target
= control target key end

     0   :  { %s336_s0 = inlined_call_operand.vmem [shape: f32[16,128], index: 0, kind: input, shape index: {}]   ;;  %s337_s1 = inlined_call_operand.vmem [shape: f32[128,128], index: 1, kind: input, shape index: {}]   ;;  %s338_s2 = inlined_call_operand.hbm [shape: f32[16,128], index: 2, kind: output, shape index: {}]  }
   0x1   :  { %v22_v0 = vld [vmem:[%s337_s1] sm:$0xff]  ;;  %v23_v1 = vld [vmem:[%s337_s1 + $0x8] sm:$0xff]  ;;  %v24_v2 = vld [vmem:[%s337_s1 + $0x10] sm:$0xff] }
   0x2   :  { %v193_v3 = vpack.c.bf16 %v23_v1, %v22_v0  ;;  %v25_v4 = vld [vmem:[%s337_s1 + $0x18] sm:$0xff]  ;;  %v26_v6 = vld [vmem:[%s337_s1 + $0x20] sm:$0xff]  ;;  %v27_v7 = vld [vmem:[%s337_s1 + $0x28] sm:$0xff] }
   0x3   :  { %v197_v5 = vpack.c.bf16 %v25_v4, %v24_v2  ;;  %v201_v8 = vpack.c.bf16 %v27_v7, %v26_v6  ;;  %v20_v9 = vld [vmem:[%s336_s0] sm:$0xff]  ;;  %v28_v10 = vld [vmem:[%s337_s1 + $0x30] sm:$0xff]  ;;  %v29_v11 = vld [vmem:[%s337_s1 + $0x38] sm:$0xff] }
   0x4   :  { %194 = vmatprep.subr.bf16.mxu0 %v193_v3  ;;  %190 = vmatprep.mubr.f32.mxu0 %v20_v9 }
   0x5   :  { %196 = vmatpush3.bf16.msra.mxu0 %v193_v3 }
   0x6   :  { %198 = vmatprep.subr.bf16.mxu0 %v197_v5 }
   0x7   :  { %7 = vsyncpa [#allocation4], 0  ;;  %v205_v12 = vpack.c.bf16 %v29_v11, %v28_v10  ;;  %v30_v13 = vld [vmem:[%s337_s1 + $0x40] sm:$0xff]  ;;  %v31_v14 = vld [vmem:[%s337_s1 + $0x48] sm:$0xff]  ;;  %s252_s17 = smov [#allocation3]  }
   0x8   :  { %v209_v15 = vpack.c.bf16 %v31_v14, %v30_v13  ;;  %v32_v16 = vld [vmem:[%s337_s1 + $0x50] sm:$0xff]  ;;  %v33_v17 = vld [vmem:[%s337_s1 + $0x58] sm:$0xff]  ;;  %v34_v19 = vld [vmem:[%s337_s1 + $0x60] sm:$0xff]  ;;  %s129_s18 = sshll.u32 %s252_s17, 4  ;;  %s130_s18 = int_to_ptr.vmem [resolvable:$true] %s129_s18 }
   0x9   :  { %200 = vmatpush3.bf16.msra.mxu0 %v197_v5  ;;  %v213_v18 = vpack.c.bf16 %v33_v17, %v32_v16  ;;  %v35_v20 = vld [vmem:[%s337_s1 + $0x68] sm:$0xff]  ;;  %v36_v22 = vld [vmem:[%s337_s1 + $0x70] sm:$0xff]  ;;  %v37_v23 = vld [vmem:[%s337_s1 + $0x78] sm:$0xff]  ;;  %s228_s19 = scalar_lea.vmem %s130_s18, 256  ;;  %p233_p1 = scmp.lt.s32.totalorder %s130_s18, %s130_s18 }
   0xa   :  { %202 = vmatprep.subr.bf16.mxu0 %v201_v8  ;;  %v217_v21 = vpack.c.bf16 %v35_v20, %v34_v19  ;;  %v221_v24 = vpack.c.bf16 %v37_v23, %v36_v22  ;;  %v21_v25 = vld [vmem:[%s336_s0 + $0x8] sm:$0xff]  ;;  %p229_p0 = scmp.ne.s32.totalorder %s130_s18, %s228_s19  ;;  %p234_p2 = scmp.lt.s32.totalorder %s228_s19, %s228_s19 }
   0xc   :  { %p235_p3 = por %p234_p2, %p233_p1 }
   0xd   :  { %204 = vmatpush3.bf16.msra.mxu0 %v201_v8 }
   0xe   :  { %206 = vmatprep.subr.bf16.mxu0 %v205_v12  ;;  %p236_p4 = pnand %p235_p3, %p229_p0 }
  0x11   :  { %208 = vmatpush3.bf16.msra.mxu0 %v205_v12 }
  0x12   :  { %210 = vmatprep.subr.bf16.mxu0 %v209_v15 }
  0x15   :  { %212 = vmatpush3.bf16.msra.mxu0 %v209_v15 }
  0x16   :  { %214 = vmatprep.subr.bf16.mxu0 %v213_v18 }
  0x19   :  { %216 = vmatpush3.bf16.msra.mxu0 %v213_v18 }
  0x1a   :  { %218 = vmatprep.subr.bf16.mxu0 %v217_v21 }
  0x1d   :  { %220 = vmatpush3.bf16.msra.mxu0 %v217_v21 }
  0x1e   :  { %222 = vmatprep.subr.bf16.mxu0 %v221_v24 }
  0x21   :  { %224 = vmatpush3.bf16.msra.mxu0 %v221_v24 }
  0x24   :  { %191 = vmatmul.mubr.f32.vlgmr.msra.gmra.mrb[0].mxu0 %v21_v25 }
  0xf7   :  { %v192_v26 = vpop.f32.mrb[0].mxu0 }
  0xf8   :  { %123 = vst [vmem:[#allocation3 + $0x8] sm:$0xff] %v192_v26  ;;  %v104_v27 = vpop.f32.mrb[1].mxu0 }
  0xf9   :  { %122 = vst [vmem:[#allocation3] sm:$0xff] %v104_v27 }
  0xfa   :  { %239 = shalt.err (!%p236_p4)
}
  0xfb   :  { %s240_s21 = scalar_lea.hbm %s338_s2, 256 }
  0xfc   :  { %p241_p5 = scmp.ne.s32.totalorder %s338_s2, %s240_s21  ;;  %p244_p6 = scmp.lt.u32.totalorder %s240_s21, %s338_s2 }
  0xfe   :  { %p246_p7 = pnand %p244_p6, %p241_p5 }
 0x100   :  { %249 = shalt.err (!%p246_p7)
}
 0x101   :  { %s253_s25 = smov 128   ;;  %s254_s26 = smov 8  }
 0x102   :  { %135 = dma.vmem_to_hbm [thread:$0]  %s130_s18, 256, %s338_s2, [#allocation4], %s253_s25, %s253_s25, %s254_s26  }
 0x103   :  { %250 = dma.done.wait [#allocation4], 256  }
 0x104   :  { %251 = vsyncadd [#allocation4], 4294967040 }
 0x105   :  { %139 = vsyncpa [#allocation4], 1 }

</bundles_post_ra>
